<compile_context>
chip_gen: v6e
topology: v6e:2x2x1
jax: 0.10.0
libtpu: 0.0.40
codegen_flags: <defaults>
</compile_context>

<pallas_src>
import math

import jax
import jax.numpy as jnp
from jax import lax
from jax.experimental import pallas as pl
from jax.experimental.pallas import tpu as pltpu

NUM_BENDS = 3  # fix_points = [True, False, True]


# ----------------------------------------------------------------------------
# Fused transposed-GEMM Pallas kernel
#   raw = W^T @ A^T + bias [+ residual^T]
#   act = relu(raw * bn_scale + bn_shift)        (eval-BN + ReLU epilogue)
# ----------------------------------------------------------------------------
def fused_gemm(w_t, a_t, bias, *, residual_t=None, bn_scale=None, bn_shift=None,
               emit=("raw",)):
    """w_t: (Cout, K); a_t: (K, M); bias/bn_*: (Cout,); residual_t: (Cout, M).

    Returns the requested outputs (each (Cout, M), float32) in `emit` order.
    """
    Cout, K = w_t.shape
    K2, M = a_t.shape
    assert K2 == K
    want_raw = "raw" in emit
    want_act = "act" in emit
    has_res = residual_t is not None
    has_bn = bn_scale is not None
    assert want_act == has_bn

    # Lane-dimension (M) tile: large tiles for HBM efficiency, but keep >= 2
    # grid blocks when M allows so both v7x TensorCores are used.
    if M >= 1024:
        tm = 512
    elif M >= 512:
        tm = 256
    else:
        tm = 128
    m_pad = ((M + tm - 1) // tm) * tm
    if m_pad != M:
        a_t = jnp.pad(a_t, ((0, 0), (0, m_pad - M)))
        if has_res:
            residual_t = jnp.pad(residual_t, ((0, 0), (0, m_pad - M)))

    w_spec = pl.BlockSpec((Cout, K), lambda i: (0, 0))
    a_spec = pl.BlockSpec((K, tm), lambda i: (0, i))
    col_spec = pl.BlockSpec((Cout, 1), lambda i: (0, 0))
    mt_spec = pl.BlockSpec((Cout, tm), lambda i: (0, i))

    # TODO(synk): on v6e/v7x cast w_t/a_t to bfloat16 (keep f32 accumulate) for
    # ~3x MXU throughput; kept f32 here to stay within the f32 reference check.
    inputs = [w_t, a_t, bias.reshape(Cout, 1)]
    in_specs = [w_spec, a_spec, col_spec]
    if has_res:
        inputs.append(residual_t)
        in_specs.append(mt_spec)
    if has_bn:
        inputs += [bn_scale.reshape(Cout, 1), bn_shift.reshape(Cout, 1)]
        in_specs += [col_spec, col_spec]

    n_in = len(inputs)
    n_out = int(want_raw) + int(want_act)
    out_shapes = [jax.ShapeDtypeStruct((Cout, m_pad), jnp.float32)] * n_out
    out_specs = [mt_spec] * n_out

    def kernel(*refs):
        in_refs = refs[:n_in]
        out_refs = refs[n_in:]
        w_ref, at_ref, b_ref = in_refs[0], in_refs[1], in_refs[2]
        idx = 3
        acc = jnp.dot(w_ref[...], at_ref[...],
                      preferred_element_type=jnp.float32) + b_ref[...]
        if has_res:
            acc = acc + in_refs[idx][...]
            idx += 1
        oi = 0
        if want_raw:
            out_refs[oi][...] = acc
            oi += 1
        if want_act:
            scale = in_refs[idx][...]
            shift = in_refs[idx + 1][...]
            out_refs[oi][...] = jnp.maximum(acc * scale + shift, 0.0)

    multi = n_out > 1
    res = pl.pallas_call(
        kernel,
        out_shape=tuple(out_shapes) if multi else out_shapes[0],
        grid_spec=pltpu.PrefetchScalarGridSpec(
            num_scalar_prefetch=0,
            grid=(m_pad // tm,),
            in_specs=in_specs,
            out_specs=out_specs if multi else out_specs[0],
        ),
        compiler_params=pltpu.CompilerParams(dimension_semantics=("parallel",)),
    )(*inputs)
    outs = list(res) if multi else [res]
    outs = [o[:, :M] for o in outs]
    return tuple(outs) if multi else outs[0]


# ----------------------------------------------------------------------------
# Channels-first conv glue (im2col in XLA, GEMM + fused epilogue in Pallas)
# ----------------------------------------------------------------------------
def im2col_cf(x_cf, kh, kw, stride, padding):
    """Channels-first im2col: x_cf (C, N, H, W) -> A^T (kh*kw*C, N*Ho*Wo)."""
    C, N, H, W = x_cf.shape
    xp = jnp.pad(x_cf, ((0, 0), (0, 0), (padding, padding), (padding, padding)))
    Ho = (H + 2 * padding - kh) // stride + 1
    Wo = (W + 2 * padding - kw) // stride + 1
    cols = []
    for ky in range(kh):
        for kx in range(kw):
            cols.append(xp[:, :, ky:ky + stride * (Ho - 1) + 1:stride,
                               kx:kx + stride * (Wo - 1) + 1:stride])
    # TODO(synk): replace this materialized kh*kw im2col by a reduction grid
    # axis indexing the padded activation directly (element-offset BlockSpecs)
    # for stride-1 convs, removing the extra HBM write + read.
    patches = jnp.stack(cols, axis=0)                     # (kh*kw, C, N, Ho, Wo)
    a_t = patches.reshape(kh * kw * C, N * Ho * Wo)
    return a_t, Ho, Wo


def conv_cf(x_cf, w_hwio, bias, *, stride=1, padding=0, residual_cf=None,
            shortcut=None, bn=None, emit=("raw",)):
    """Conv2d in channels-first layout with fused BN/ReLU/residual epilogue.

    x_cf: (Cin, N, H, W); w_hwio: (kh, kw, Cin, Cout).
    `shortcut=(x_raw_cf, ws_hwio_1x1, bs, s_stride)` folds a 1x1 strided
    shortcut conv into the same GEMM via K-concatenation.
    Returns one (Cout, N, Ho, Wo) array per entry of `emit`.
    """
    Cin, N, H, W = x_cf.shape
    kh, kw, Cin2, Cout = w_hwio.shape
    assert Cin == Cin2
    a_t, Ho, Wo = im2col_cf(x_cf, kh, kw, stride, padding)
    w_t = jnp.transpose(w_hwio, (3, 0, 1, 2)).reshape(Cout, kh * kw * Cin)
    b = bias
    if shortcut is not None:
        xr_cf, ws_hwio, bs, s_stride = shortcut
        Cs = xr_cf.shape[0]
        # 1x1 conv, stride s, pad 0 == strided spatial subsample.
        a_s = xr_cf[:, :, ::s_stride, ::s_stride].reshape(Cs, -1)
        assert a_s.shape[1] == a_t.shape[1]
        ws_t = jnp.transpose(ws_hwio, (3, 0, 1, 2)).reshape(Cout, Cs)
        a_t = jnp.concatenate([a_t, a_s], axis=0)
        w_t = jnp.concatenate([w_t, ws_t], axis=1)
        b = b + bs
    K = w_t.shape[1]
    kp = (-K) % 8                                         # stem: 27 -> 32
    if kp:
        a_t = jnp.pad(a_t, ((0, kp), (0, 0)))
        w_t = jnp.pad(w_t, ((0, 0), (0, kp)))
    residual_t = None
    if residual_cf is not None:
        residual_t = residual_cf.reshape(Cout, N * Ho * Wo)
    bn_scale = bn_shift = None
    if bn is not None:
        gamma, beta, mean, var = bn
        bn_scale = gamma / jnp.sqrt(var + 1e-5)
        bn_shift = beta - mean * bn_scale
    outs = fused_gemm(w_t, a_t, b, residual_t=residual_t,
                      bn_scale=bn_scale, bn_shift=bn_shift, emit=emit)
    if isinstance(outs, tuple):
        return tuple(o.reshape(Cout, N, Ho, Wo) for o in outs)
    return outs.reshape(Cout, N, Ho, Wo)


# ----------------------------------------------------------------------------
# Curve-parameter blending (the curves.* coeffs_t mechanism)
# ----------------------------------------------------------------------------
def bezier_coeffs(t, num_bends=NUM_BENDS):
    n = num_bends - 1
    return jnp.array([math.comb(n, i) * (t ** i) * ((1.0 - t) ** (n - i))
                      for i in range(num_bends)], jnp.float32)


def blend(p_bends, coeffs_t):
    """p_bends: (num_bends, ...) per-bend parameter -> coeffs-weighted sum."""
    return jnp.tensordot(coeffs_t, p_bends, axes=1)


def blend_bn(bn, c):
    gamma, beta, mean, var = bn
    return (blend(gamma, c), blend(beta, c), mean, var)   # running stats shared


def blend_block(p, c):
    q = {"bn1": blend_bn(p["bn1"], c),
         "conv1_w": blend(p["conv1_w"], c), "conv1_b": blend(p["conv1_b"], c),
         "bn2": blend_bn(p["bn2"], c),
         "conv2_w": blend(p["conv2_w"], c), "conv2_b": blend(p["conv2_b"], c)}
    if "short_w" in p:
        q["short_w"] = blend(p["short_w"], c)
        q["short_b"] = blend(p["short_b"], c)
    return q


def blend_params(params, coeffs_t):
    q = {"conv1_w": blend(params["conv1_w"], coeffs_t),
         "conv1_b": blend(params["conv1_b"], coeffs_t),
         "bn1": blend_bn(params["bn1"], coeffs_t),
         "lin_w": blend(params["lin_w"], coeffs_t),
         "lin_b": blend(params["lin_b"], coeffs_t)}
    for li in (1, 2, 3):
        q[f"layer{li}"] = [blend_block(b, coeffs_t) for b in params[f"layer{li}"]]
        q[f"layer{li}_strides"] = params[f"layer{li}_strides"]
    return q


# ----------------------------------------------------------------------------
# WideResNet forward (fused blocks)
# ----------------------------------------------------------------------------
def wide_basic_fused(x_raw, x_act, p, stride, next_bn):
    """One WideBasic block (dropout p=0 -> identity).

    x_raw: raw block input (for the residual/shortcut path).
    x_act: relu(bn1(x_raw)), already produced by the previous layer's epilogue.
    Returns (z_raw, z_act) with
      z_raw = conv2(relu(bn2(conv1(x_act)))) + shortcut(x_raw)
      z_act = relu(next_bn(z_raw))
    """
    a2 = conv_cf(x_act, p["conv1_w"], p["conv1_b"], stride=1, padding=1,
                 bn=p["bn2"], emit=("act",))
    if "short_w" in p:
        shortcut = (x_raw, p["short_w"], p["short_b"], stride)
        residual = None
    else:
        shortcut = None
        residual = x_raw
    z_raw, z_act = conv_cf(a2, p["conv2_w"], p["conv2_b"], stride=stride,
                           padding=1, residual_cf=residual, shortcut=shortcut,
                           bn=next_bn, emit=("raw", "act"))
    return z_raw, z_act


def wide_resnet_forward(x_nchw, coeffs_t, raw_params):
    params = blend_params(raw_params, coeffs_t)
    x_cf = jnp.transpose(x_nchw, (1, 0, 2, 3))            # NCHW -> (C, N, H, W)
    blocks, strides = [], []
    for li in (1, 2, 3):
        blocks += list(params[f"layer{li}"])
        strides += list(params[f"layer{li}_strides"])
    # bn1+relu of block i is fused into the epilogue of the layer producing its
    # input; the network's final bn1+relu is fused into the last conv2.
    next_bns = [b["bn1"] for b in blocks[1:]] + [params["bn1"]]

    raw, act = conv_cf(x_cf, params["conv1_w"], params["conv1_b"],
                       stride=1, padding=1, bn=blocks[0]["bn1"],
                       emit=("raw", "act"))
    for blk, s, nbn in zip(blocks, strides, next_bns):
        raw, act = wide_basic_fused(raw, act, blk, s, nbn)

    pooled = jnp.mean(act, axis=(2, 3))                   # avg_pool2d(., 8) -> (C, N)
    # Final linear is (2,64)@(64,10): launch overhead > compute, keep in XLA.
    return pooled.T @ params["lin_w"] + params["lin_b"]


# ----------------------------------------------------------------------------
# Deterministic parameter init (per-bend, shapes follow the PyTorch module)
# ----------------------------------------------------------------------------
def init_conv(key, kh, kw, cin, cout):
    k1, k2 = jax.random.split(key)
    w = 0.05 * jax.random.normal(k1, (NUM_BENDS, kh, kw, cin, cout), jnp.float32)
    b = 0.05 * jax.random.normal(k2, (NUM_BENDS, cout), jnp.float32)
    return w, b


def init_bn(key, c):
    k1, k2, k3, k4 = jax.random.split(key, 4)
    gamma = 1.0 + 0.1 * jax.random.normal(k1, (NUM_BENDS, c), jnp.float32)
    beta = 0.1 * jax.random.normal(k2, (NUM_BENDS, c), jnp.float32)
    mean = 0.1 * jax.random.normal(k3, (c,), jnp.float32)
    var = jax.random.uniform(k4, (c,), jnp.float32, 0.5, 1.5)
    return (gamma, beta, mean, var)


def init_wide_basic(key, in_planes, planes, stride):
    keys = jax.random.split(key, 5)
    p = {}
    p["bn1"] = init_bn(keys[0], in_planes)
    p["conv1_w"], p["conv1_b"] = init_conv(keys[1], 3, 3, in_planes, planes)
    p["bn2"] = init_bn(keys[2], planes)
    p["conv2_w"], p["conv2_b"] = init_conv(keys[3], 3, 3, planes, planes)
    if stride != 1 or in_planes != planes:
        p["short_w"], p["short_b"] = init_conv(keys[4], 1, 1, in_planes, planes)
    return p


def init_wide_resnet(key, num_classes=10, depth=10, widen_factor=1):
    assert (depth - 4) % 6 == 0
    n = (depth - 4) // 6
    k = widen_factor
    nstages = [16, 16 * k, 32 * k, 64 * k]
    keys = jax.random.split(key, 6)
    params = {}
    params["conv1_w"], params["conv1_b"] = init_conv(keys[0], 3, 3, 3, nstages[0])

    in_planes = nstages[0]
    for li, (planes, first_stride, kk) in enumerate(
        [(nstages[1], 1, keys[1]), (nstages[2], 2, keys[2]), (nstages[3], 2, keys[3])],
        start=1,
    ):
        strides = [first_stride] + [1] * (n - 1)
        blk_keys = jax.random.split(kk, n)
        blocks = []
        for s, bk in zip(strides, blk_keys):
            blocks.append(init_wide_basic(bk, in_planes, planes, s))
            in_planes = planes
        params[f"layer{li}"] = blocks
        params[f"layer{li}_strides"] = strides

    params["bn1"] = init_bn(keys[4], nstages[3])
    k1, k2 = jax.random.split(keys[5])
    params["lin_w"] = 0.05 * jax.random.normal(
        k1, (NUM_BENDS, nstages[3], num_classes), jnp.float32)
    params["lin_b"] = 0.05 * jax.random.normal(
        k2, (NUM_BENDS, num_classes), jnp.float32)
    return params


# ----------------------------------------------------------------------------
# Pure-JAX reference (lax.conv, NHWC) for correctness check
# ----------------------------------------------------------------------------
def ref_conv2d(x, w, b, stride, padding):
    dn = lax.conv_dimension_numbers(x.shape, w.shape, ("NHWC", "HWIO", "NHWC"))
    y = lax.conv_general_dilated(
        x, w, (stride, stride), [(padding, padding), (padding, padding)],
        dimension_numbers=dn, precision=lax.Precision.HIGHEST)
    return y + b


def ref_bn_relu(x, bn):
    gamma, beta, mean, var = bn
    y = (x - mean) / jnp.sqrt(var + 1e-5) * gamma + beta
    return jnp.maximum(y, 0.0)


def ref_wide_basic(x, p, stride):
    out = ref_bn_relu(x, p["bn1"])
    out = ref_conv2d(out, p["conv1_w"], p["conv1_b"], 1, 1)
    out = ref_bn_relu(out, p["bn2"])
    out = ref_conv2d(out, p["conv2_w"], p["conv2_b"], stride, 1)
    if "short_w" in p:
        sc = ref_conv2d(x, p["short_w"], p["short_b"], stride, 0)
    else:
        sc = x
    return out + sc


def ref_forward(x_nchw, coeffs_t, raw_params):
    params = blend_params(raw_params, coeffs_t)
    x = jnp.transpose(x_nchw, (0, 2, 3, 1))
    out = ref_conv2d(x, params["conv1_w"], params["conv1_b"], 1, 1)
    for li in (1, 2, 3):
        for blk, s in zip(params[f"layer{li}"], params[f"layer{li}_strides"]):
            out = ref_wide_basic(out, blk, s)
    out = ref_bn_relu(out, params["bn1"])
    out = jnp.mean(out, axis=(1, 2))
    return out @ params["lin_w"] + params["lin_b"]


# ----------------------------------------------------------------------------
if __name__ == "__main__":
    key = jax.random.PRNGKey(0)
    kx, kp = jax.random.split(key)

    # Small WRN: depth=10 (1 block per stage), widen_factor=1, num_classes=10.
    params = init_wide_resnet(kp, num_classes=10, depth=10, widen_factor=1)

    # PyTorch-style NCHW input (CIFAR-like 32x32 so avg_pool2d(., 8) yields 1x1).
    x = jax.random.normal(kx, (2, 3, 32, 32), jnp.float32)
    coeffs_t = bezier_coeffs(0.35)                        # curve point t=0.35

    out = wide_resnet_forward(x, coeffs_t, params)
    out = jax.block_until_ready(out)

    ref = jax.block_until_ready(ref_forward(x, coeffs_t, params))
    assert out.shape == (2, 10)
    assert jnp.allclose(out, ref, rtol=1e-3, atol=1e-3), (
        f"max abs diff {jnp.max(jnp.abs(out - ref))}")

    print("KERNEL_OK")
</pallas_src>

<mosaic_0001>
module attributes {stable_mosaic.version = 11 : i64} {
  func.func @kernel(%arg0: i32, %arg1: memref<16x32xf32, #tpu.memory_space<vmem>>, %arg2: memref<32x512xf32, #tpu.memory_space<vmem>>, %arg3: memref<16x1xf32, #tpu.memory_space<vmem>>, %arg4: memref<16x1xf32, #tpu.memory_space<vmem>>, %arg5: memref<16x1xf32, #tpu.memory_space<vmem>>, %arg6: memref<16x512xf32, #tpu.memory_space<vmem>>, %arg7: memref<16x512xf32, #tpu.memory_space<vmem>>) attributes {dimension_semantics = [#tpu.dimension_semantics<parallel>], iteration_bounds = array<i64: 4>, scalar_prefetch = 0 : i64, scratch_operands = 0 : i64, tpu.core_type = #tpu.core_type<tc>, window_params = [{pipeline_mode = #tpu.pipeline_mode<synchronous>, transform_indices = @transform_0, window_bounds = array<i64: 16, 32>}, {transform_indices = @transform_1, window_bounds = array<i64: 32, 512>}, {pipeline_mode = #tpu.pipeline_mode<synchronous>, transform_indices = @transform_2, window_bounds = array<i64: 16, 1>}, {pipeline_mode = #tpu.pipeline_mode<synchronous>, transform_indices = @transform_3, window_bounds = array<i64: 16, 1>}, {pipeline_mode = #tpu.pipeline_mode<synchronous>, transform_indices = @transform_4, window_bounds = array<i64: 16, 1>}, {transform_indices = @transform_5, window_bounds = array<i64: 16, 512>}, {transform_indices = @transform_6, window_bounds = array<i64: 16, 512>}]} {
    %c0 = arith.constant 0 : index
    %c0_0 = arith.constant 0 : index
    %0 = vector.load %arg1[%c0, %c0_0] : memref<16x32xf32, #tpu.memory_space<vmem>>, vector<16x32xf32>
    %c0_1 = arith.constant 0 : index
    %c0_2 = arith.constant 0 : index
    %1 = vector.load %arg2[%c0_1, %c0_2] : memref<32x512xf32, #tpu.memory_space<vmem>>, vector<32x512xf32>
    %cst = arith.constant dense<0.000000e+00> : vector<16x512xf32>
    %2 = tpu.matmul %0, %1, %cst {dimension_numbers = #tpu.dot_dimension_numbers<[1], [0], [0], [1], [0, 0, 1, 1], [], []>} : vector<16x32xf32>, vector<32x512xf32>, vector<16x512xf32> -> vector<16x512xf32>
    %c0_3 = arith.constant 0 : index
    %c0_4 = arith.constant 0 : index
    %3 = vector.load %arg3[%c0_3, %c0_4] : memref<16x1xf32, #tpu.memory_space<vmem>>, vector<16x1xf32>
    %4 = vector.broadcast %3 : vector<16x1xf32> to vector<16x512xf32>
    %5 = arith.addf %2, %4 : vector<16x512xf32>
    %c0_5 = arith.constant 0 : index
    %c0_6 = arith.constant 0 : index
    %6 = vector.load %arg6[%c0_5, %c0_6] : memref<16x512xf32, #tpu.memory_space<vmem>>, vector<16x512xf32>
    tpu.vector_store %arg6[%c0_5, %c0_6], %5 {strides = array<i32>} : memref<16x512xf32, #tpu.memory_space<vmem>>, vector<16x512xf32>,
    %c0_7 = arith.constant 0 : index
    %c0_8 = arith.constant 0 : index
    %7 = vector.load %arg4[%c0_7, %c0_8] : memref<16x1xf32, #tpu.memory_space<vmem>>, vector<16x1xf32>
    %c0_9 = arith.constant 0 : index
    %c0_10 = arith.constant 0 : index
    %8 = vector.load %arg5[%c0_9, %c0_10] : memref<16x1xf32, #tpu.memory_space<vmem>>, vector<16x1xf32>
    %9 = vector.broadcast %7 : vector<16x1xf32> to vector<16x512xf32>
    %10 = arith.mulf %5, %9 : vector<16x512xf32>
    %11 = vector.broadcast %8 : vector<16x1xf32> to vector<16x512xf32>
    %12 = arith.addf %10, %11 : vector<16x512xf32>
    %cst_11 = arith.constant 0.000000e+00 : f32
    %13 = vector.broadcast %cst_11 : f32 to vector<16x512xf32>
    %14 = arith.maximumf %12, %13 : vector<16x512xf32>
    %c0_12 = arith.constant 0 : index
    %c0_13 = arith.constant 0 : index
    %15 = vector.load %arg7[%c0_12, %c0_13] : memref<16x512xf32, #tpu.memory_space<vmem>>, vector<16x512xf32>
    tpu.vector_store %arg7[%c0_12, %c0_13], %14 {strides = array<i32>} : memref<16x512xf32, #tpu.memory_space<vmem>>, vector<16x512xf32>,
    return
  }
  func.func @transform_0(%arg0: i32) -> (i32, i32) {
    %c0_i32 = arith.constant 0 : i32
    %c0_i32_0 = arith.constant 0 : i32
    %c0_i32_1 = arith.constant 0 : i32
    return %c0_i32, %c0_i32_0 : i32, i32
  }
  func.func @transform_1(%arg0: i32) -> (i32, i32) {
    %c0_i32 = arith.constant 0 : i32
    %c0_i32_0 = arith.constant 0 : i32
    return %c0_i32, %arg0 : i32, i32
  }
  func.func @transform_2(%arg0: i32) -> (i32, i32) {
    %c0_i32 = arith.constant 0 : i32
    %c0_i32_0 = arith.constant 0 : i32
    %c0_i32_1 = arith.constant 0 : i32
    return %c0_i32, %c0_i32_0 : i32, i32
  }
  func.func @transform_3(%arg0: i32) -> (i32, i32) {
    %c0_i32 = arith.constant 0 : i32
    %c0_i32_0 = arith.constant 0 : i32
    %c0_i32_1 = arith.constant 0 : i32
    return %c0_i32, %c0_i32_0 : i32, i32
  }
  func.func @transform_4(%arg0: i32) -> (i32, i32) {
    %c0_i32 = arith.constant 0 : i32
    %c0_i32_0 = arith.constant 0 : i32
    %c0_i32_1 = arith.constant 0 : i32
    return %c0_i32, %c0_i32_0 : i32, i32
  }
  func.func @transform_5(%arg0: i32) -> (i32, i32) {
    %c0_i32 = arith.constant 0 : i32
    %c0_i32_0 = arith.constant 0 : i32
    return %c0_i32, %arg0 : i32, i32
  }
  func.func @transform_6(%arg0: i32) -> (i32, i32) {
    %c0_i32 = arith.constant 0 : i32
    %c0_i32_0 = arith.constant 0 : i32
    return %c0_i32, %arg0 : i32, i32
  }
}

</mosaic_0001>

<bundles_post_ra>
// kernel: tpu_custom_call.1
= control target key start
LH: loop header
LB: loop body
LE: loop exit
PB: predicated region body
PF: predicated region fallthrough
CT: control target
= control target key end

     0   :  { %12 = vsyncpa [#allocation3], 0  ;;  %s1202_s0 = inlined_call_operand.vmem [shape: f32[16,32], index: 0, kind: input, shape index: {}]   ;;  %s1203_s1 = inlined_call_operand.hbm [shape: f32[32,2048], index: 1, kind: input, shape index: {}]   ;;  %s1204_s2 = inlined_call_operand.vmem [shape: f32[16,1], index: 2, kind: input, shape index: {}]   ;;  %s1205_s3 = inlined_call_operand.vmem [shape: f32[16,1], index: 3, kind: input, shape index: {}]   ;;  %s1206_s4 = inlined_call_operand.vmem [shape: f32[16,1], index: 4, kind: input, shape index: {}]   ;;  %s1207_s5 = inlined_call_operand.hbm [shape: f32[16,2048], index: 5, kind: output, shape index: {0}]   ;;  %s1208_s6 = inlined_call_operand.hbm [shape: f32[16,2048], index: 6, kind: output, shape index: {1}]  }
   0x1   :  { %14 = vsyncpa [#allocation3 + $0x1], 0 }
   0x2   :  { %15 = vsyncpa [#allocation4], 0 }
   0x3   :  { %17 = vsyncpa [#allocation4 + $0x1], 0 }
   0x4   :  { %18 = vsyncpa [#allocation7], 0 }
   0x5   :  { %20 = vsyncpa [#allocation7 + $0x1], 0  ;;  %s935_s21 = smov 0   ;;  %s937_s22 = smov 0  }
   0x6   :  { %s939_s23 = smov 0   ;;  %s941_s24 = smov 0  }
   0x7 LB: > { %s956_s25 = sadd.s32 4294967295, %s887_s24   ;;  %s679_s26 = sadd.s32 4294967294, %s887_s24   ;;  %s887_s24 = sphi %s941_s24, %s1225_s24   ;;  %s883_s23 = sphi %s939_s23, %s1224_s23   ;;  %s879_s22 = sphi %s937_s22, %s1223_s22   ;;  %s875_s21 = sphi %s935_s21, %s1222_s21  }
   0x8   : > { %s960_s27 = sadd.s32 1, %s887_s24   ;;  %s54_s28 = sadd.s32 1, %s883_s23 }
   0x9   : > { %s51_s29 = ssub.s32 %s887_s24, %s960_s27  ;;  %p61_p0 = scmp.ne.s32.totalorder %s883_s23, %s879_s22 }
   0xa   : > { %p52_p1 = scmp.eq.s32.totalorder %s51_s29, 0  ;;  %p62_p2 = scmp.eq.s32.totalorder %s887_s24, 0 }
   0xb   : > { %p67_p3 = scmp.ne.s32.totalorder %s879_s22, %s875_s21  ;;  %p68_p4 = scmp.eq.s32.totalorder %s956_s25, 0 }
   0xc   : > { %s972_s30 = scalar_select %p52_p1, %s883_s23, %s54_s28  }
   0xd   : > { %p974_p5 = por %p62_p2, %p61_p0  ;;  %p978_p6 = por %p68_p4, %p67_p3 }
   0xe   : > { %p154_p7 = scmp.eq.s32.totalorder %s956_s25, 3  ;;  %p160_p8 = scmp.eq.s32.totalorder %s679_s26, 3 }
   0xf   : > { %s1213_s8 = scalar_select %p978_p6, 1, 0 }
  0x10   : > { %p721_p9 = scmp.lt.s32.totalorder %s887_s24, 4  ;;  %p984_p10 = por %p154_p7, %p61_p0 }
  0x11   : > { %p988_p11 = por %p160_p8, %p67_p3  ;;  %s218_s11 = sand.u32 1, %s883_s23  }
  0x12   : > { %s1214_s9 = scalar_select %p984_p10, 1, 0 }
  0x13   : > { %s1215_s10 = scalar_select %p988_p11, 1, 0 }
  0x14   : > { %s701_s12 = sshll.u32 %s887_s24, 9  ;;  %s682_s13 = sshll.u32 %s218_s11, 7 }
  0x15   : > { %s997_s16 = scalar_lea.hbm %s1203_s1, %s701_s12  ;;  %s222_s17 = scalar_lea.vmem [#allocation2], %s682_s13 }
  0x16   : > { %s229_s18 = sshll.u32 %s222_s17, 4  ;;  %p1001_p12 = pnand %p721_p9, %p974_p5  ;;  %s1005_s18 = int_to_ptr.vmem [resolvable:$true] %s229_s18 }
  0x17   : > { %s1008_s20 = scalar_lea.sflag [#allocation3], %s218_s11  ;;  %s765_s26 = scalar_lea.hbm %s997_s16, 2048 }
  0x18   : > { %p766_p0 = scmp.ne.s32.totalorder %s997_s16, %s765_s26  ;;  %p767_p1 = pneg %p1001_p12 }
  0x19   : > { %s770_s7 = scalar_lea.hbm %s1203_s1, 8192  ;;  %p771_p4 = scmp.lt.s32.totalorder %s997_s16, %s1203_s1 }
  0x1a   : > { %p768_p2 = pnand %p767_p1, %p766_p0  ;;  %p772_p5 = scmp.lt.s32.totalorder %s770_s7, %s765_s26 }
  0x1c   : > { %p769_p3 = pneg %p768_p2  ;;  %p773_p7 = por %p772_p5, %p771_p4 }
  0x1e   : > { %p774_p8 = pnand %p773_p7, %p769_p3 }
  0x20   : > { %777 = shalt.err (!%p774_p8)
}
  0x21   : > { %s778_s11 = scalar_lea.vmem %s1005_s18, 2048  ;;  %s889_s14 = smov [#allocation2]  }
  0x22   : > { %p779_p9 = scmp.ne.s32.totalorder %s1005_s18, %s778_s11  ;;  %s783_s15 = sshll.u32 %s889_s14, 4  ;;  %s784_s15 = int_to_ptr.vmem [resolvable:$false] %s783_s15 }
  0x23   : > { %s785_s17 = scalar_lea.vmem %s784_s15, 4096  ;;  %p786_p2 = scmp.lt.s32.totalorder %s1005_s18, %s784_s15 }
  0x24   : > { %p781_p13 = pnand %p779_p9, %p767_p1  ;;  %p787_p11 = scmp.lt.s32.totalorder %s785_s17, %s778_s11 }
  0x26   : > { %p782_p0 = pneg %p781_p13  ;;  %p788_p10 = por %p787_p11, %p786_p2 }
  0x28   : > { %p789_p6 = pnand %p788_p10, %p782_p0 }
  0x2a   : > { %792 = shalt.err (!%p789_p6)
}
  0x2b   : > { %s890_s26 = smov 2048   ;;  %s891_s28 = smov 512  }
  0x2c   : > { %s892_s29 = smov 32   ;;  %p237_p13 = scmp.lt.s32.totalorder %s887_s24, 5 }
  0x2d   : > { %713 = dma.hbm_to_vmem [thread:$0]  (!%p1001_p12), %s997_s16, 2048, %s1005_s18, %s1008_s20, %s890_s26, %s891_s28, %s892_s29  }
  0x2e   : > { %p1217_p1 = scmp.ge.s32.totalorder %s887_s24, 1 }
  0x30   : > { %p238_p3 = pnand %p1217_p1, %p237_p13 }
  0x31   : > { %s1033_s7 = sand.u32 (!%p238_p3), 1, %s879_s22   ;;  %p1218_p6 = scmp.ne.s32.totalorder (!%p238_p3), %s1213_s8, 0 }
  0x32   : > { %241 = sbr.rel (%p238_p3) target bundleno = 308 (0x134), region = 40  ;;  %s686_s12 = sshll.u32 (!%p238_p3), %s1033_s7, 7 }
  0x33   : > { %s244_s13 = scalar_lea.sflag (!%p238_p3), [#allocation3], %s1033_s7  ;;  %s1037_s11 = scalar_lea.vmem (!%p238_p3), [#allocation2], %s686_s12 }
  0x37   : > { %862 = dma.done.wait (%p1218_p6), %s244_s13, 2048  }
  0x38   : > { %864 = vsyncadd (%p1218_p6), %s244_s13, 4294965248  ;;  %v893_v0 = vmov 0.0   ;;  %v894_v1 = vmov 0   ;;  %v299_v2 = vld [vmem:[%s1037_s11 + $0x68] sm:$0xff]  ;;  %v301_v3 = vld [vmem:[%s1037_s11 + $0x78] sm:$0xff]  ;;  %vm314_vm0 = vcmask 261120  }
  0x39   : > { %385 = vmatprep.mubr.f32.mxu0 %v893_v0  ;;  %462 = vmatprep.mubr.f32.mxu1 %v893_v0  ;;  %v298_v4 = vld [vmem:[%s1037_s11 + $0x60] sm:$0xff]  ;;  %v300_v5 = vld [vmem:[%s1037_s11 + $0x70] sm:$0xff]  ;;  %v295_v6 = vld [vmem:[%s1037_s11 + $0x48] sm:$0xff]  ;;  %s687_s18 = sshll.u32 %s1033_s7, 6  ;;  %s1211_s14 = sshll.u32 %s956_s25, 9 }
  0x3a   : > { %764 = vset.pattern.permute.xlu1 %v894_v1  ;;  %763 = vset.pattern.permute.xlu0 %v894_v1  ;;  %v297_v7 = vld [vmem:[%s1037_s11 + $0x58] sm:$0xff]  ;;  %v294_v8 = vld [vmem:[%s1037_s11 + $0x40] sm:$0xff]  ;;  %v296_v9 = vld [vmem:[%s1037_s11 + $0x50] sm:$0xff]  ;;  %s1090_s19 = scalar_lea.vmem [#allocation5], %s687_s18  ;;  %s1105_s26 = scalar_lea.hbm %s1207_s5, %s1211_s14 }
  0x3b   : > { %345 = vmatprep.subr.mxu0 %v299_v2  ;;  %422 = vmatprep.subr.mxu1 %v301_v3  ;;  %v291_v10 = vld [vmem:[%s1037_s11 + $0x28] sm:$0xff]  ;;  %v293_v11 = vld [vmem:[%s1037_s11 + $0x38] sm:$0xff]  ;;  %v290_v12 = vld [vmem:[%s1037_s11 + $0x20] sm:$0xff]  ;;  %s558_s20 = sshll.u32 %s1090_s19, 4  ;;  %s1111_s28 = scalar_lea.vmem [#allocation6], %s687_s18  ;;  %s1098_s20 = int_to_ptr.vmem [resolvable:$true] %s558_s20 }
  0x3c   : > { %346 = vmatpush1.msra.mxu0 %v298_v4  ;;  %423 = vmatpush1.msra.mxu1 %v300_v5  ;;  %v292_v13 = vld [vmem:[%s1037_s11 + $0x30] sm:$0xff]  ;;  %v287_v14 = vld [vmem:[%s1037_s11 + $0x8] sm:$0xff]  ;;  %v289_v15 = vld [vmem:[%s1037_s11 + $0x18] sm:$0xff]  ;;  %s574_s29 = sshll.u32 %s1111_s28, 4  ;;  %s540_s12 = scalar_lea.sflag [#allocation4], %s1033_s7  ;;  %s1148_s29 = int_to_ptr.vmem [resolvable:$true] %s574_s29 }
  0x3d   : > { %347 = vmatprep.subr.mxu0 %v295_v6  ;;  %424 = vmatprep.subr.mxu1 %v297_v7  ;;  %v286_v16 = vld [vmem:[%s1037_s11] sm:$0xff]  ;;  %v288_v17 = vld [vmem:[%s1037_s11 + $0x10] sm:$0xff]  ;;  %v285_v21 = vld [vmem:[%s1202_s0 + $0x8] sm:$0xff]  ;;  %s793_s13 = scalar_lea.vmem %s1098_s20, 1024  ;;  %p1219_p11 = scmp.ne.s32.totalorder %s1214_s9, 0 }
  0x3e   : > { %348 = vmatpush1.msra.mxu0 %v294_v8  ;;  %425 = vmatpush1.msra.mxu1 %v296_v9  ;;  %v284_v18 = vld [vmem:[%s1202_s0] sm:$0xff]  ;;  %v484_v22 = vld [vmem:[%s1205_s3 + $0x8] sm:$0xff]  ;;  %p794_p10 = scmp.ne.s32.totalorder %s1098_s20, %s793_s13  ;;  %s895_s11 = smov [#allocation5]  }
  0x3f   : > { %349 = vmatprep.subr.mxu0 %v291_v10  ;;  %426 = vmatprep.subr.mxu1 %v293_v11  ;;  %v483_v19 = vld [vmem:[%s1205_s3] sm:$0xff]  ;;  %v303_v23 = vld [vmem:[%s1204_s2 + $0x8] sm:$0xff]  ;;  %s797_s8 = sshll.u32 %s895_s11, 4  ;;  %s798_s8 = int_to_ptr.vmem [resolvable:$false] %s797_s8 }
  0x40   : > { %350 = vmatpush1.msra.mxu0 %v290_v12  ;;  %427 = vmatpush1.msra.mxu1 %v292_v13  ;;  %v302_v20 = vld [vmem:[%s1204_s2] sm:$0xff]  ;;  %v486_v24 = vld [vmem:[%s1206_s4 + $0x8] sm:$0xff]  ;;  %p795_p12 = pnand %p794_p10, %p1219_p11  ;;  %s799_s16 = scalar_lea.vmem %s798_s8, 2048 }
  0x41   : > { %351 = vmatprep.subr.mxu0 %v287_v14  ;;  %428 = vmatprep.subr.mxu1 %v289_v15  ;;  %v485_v25 = vld [vmem:[%s1206_s4] sm:$0xff]  ;;  %p800_p5 = scmp.lt.s32.totalorder %s1098_s20, %s798_s8  ;;  %p801_p7 = scmp.lt.s32.totalorder %s799_s16, %s793_s13 }
  0x42   : > { %352 = vmatpush1.msra.mxu0 %v286_v16  ;;  %429 = vmatpush1.msra.mxu1 %v288_v17  ;;  %p796_p4 = pneg %p795_p12 }
  0x43   : > { %689 = vmatmul.mubr.msk.f32.vlgmr.msra.gmra.mxu0 %vm314_vm0, %v284_v18  ;;  %691 = vmatmul.mubr.msk.f32.vlgmr.msra.gmra.mxu1 %vm314_vm0, %v284_v18  ;;  %p802_p8 = por %p801_p7, %p800_p5 }
  0x44   : > { %391 = vmatprep.mubr.f32.mxu0 %v893_v0  ;;  %468 = vmatprep.mubr.f32.mxu1 %v893_v0 }
  0x45   : > { %489 = vperm.xlu1 %764, %v483_v19   ;;  %306 = vperm.xlu0 %763, %v302_v20   ;;  %p803_p9 = pnand %p802_p8, %p796_p4 }
  0x47   : > { %690 = vmatmul.mubr.msk.f32.gmra.mxu0 %vm314_vm0, %v285_v21  ;;  %692 = vmatmul.mubr.msk.f32.gmra.mxu1 %vm314_vm0, %v285_v21 }
  0x49   : > { %494 = vperm.xlu1 %764, %v484_v22   ;;  %311 = vperm.xlu0 %763, %v303_v23  }
  0x4d   : > { %512 = vperm.xlu1 %764, %v486_v24   ;;  %507 = vperm.xlu0 %763, %v485_v25  }
  0xc0   : > { %v307_v26 = vpop.permute.xlu0 %306  ;;  %v490_v27 = vpop.permute.xlu1 %489 }
  0xc4   : > { %v312_v28 = vpop.permute.xlu0 %311  ;;  %v495_v35 = vpop.permute.xlu1 %494 }
  0xc8   : > { %v508_v38 = vpop.permute.xlu0 %507  ;;  %v513_v59 = vpop.permute.xlu1 %512 }
 0x103   : > { %v387_v29 = vpop.f32.mrf.mxu0  ;;  %v464_v30 = vpop.f32.mrf.mxu1 }
 0x104   : > { %v388_v31 = vadd.f32 %v387_v29, %v307_v26  ;;  %v465_v32 = vadd.f32 %v464_v30, %v307_v26 }
 0x105   : > { %v389_v33 = vpop.f32.mrf.mxu0  ;;  %v466_v34 = vpop.f32.mrf.mxu1 }
 0x106   : > { %475 = vst [vmem:[%s1090_s19] sm:$0xff] %v388_v31  ;;  %v497_v36 = vmul.f32 %v490_v27, %v388_v31  ;;  %477 = vst [vmem:[%s1090_s19 + $0x10] sm:$0xff] %v465_v32  ;;  %v499_v37 = vmul.f32 %v490_v27, %v465_v32  ;;  %v390_v39 = vadd.f32 %v389_v33, %v307_v26 }
 0x107   : > { %v467_v40 = vadd.f32 %v466_v34, %v307_v26  ;;  %v393_v41 = vpop.f32.mrf.mxu0  ;;  %v470_v42 = vpop.f32.mrf.mxu1 }
 0x108   : > { %v515_v43 = vadd.f32 %v508_v38, %v497_v36  ;;  %v517_v44 = vadd.f32 %v508_v38, %v499_v37  ;;  %476 = vst [vmem:[%s1090_s19 + $0x8] sm:$0xff] %v390_v39  ;;  %v498_v45 = vmul.f32 %v490_v27, %v390_v39  ;;  %v394_v47 = vadd.f32 %v393_v41, %v312_v28 }
 0x109   : > { %478 = vst [vmem:[%s1090_s19 + $0x18] sm:$0xff] %v467_v40  ;;  %v500_v46 = vmul.f32 %v490_v27, %v467_v40  ;;  %v471_v48 = vadd.f32 %v470_v42, %v312_v28  ;;  %v395_v49 = vpop.f32.mrf.mxu0  ;;  %v472_v50 = vpop.f32.mrf.mxu1 }
 0x10a   : > { %v523_v51 = vmax.f32 %v515_v43, 0.0  ;;  %v525_v52 = vmax.f32 %v517_v44, 0.0  ;;  %v516_v53 = vadd.f32 %v508_v38, %v498_v45  ;;  %479 = vst [vmem:[%s1090_s19 + $0x20] sm:$0xff] %v394_v47  ;;  %v501_v55 = vmul.f32 %v495_v35, %v394_v47 }
 0x10b   : > { %v518_v54 = vadd.f32 %v508_v38, %v500_v46  ;;  %481 = vst [vmem:[%s1090_s19 + $0x30] sm:$0xff] %v471_v48  ;;  %v503_v56 = vmul.f32 %v495_v35, %v471_v48  ;;  %v396_v57 = vadd.f32 %v395_v49, %v312_v28  ;;  %v473_v58 = vadd.f32 %v472_v50, %v312_v28 }
 0x10c   : > { %531 = vst [vmem:[%s1111_s28] sm:$0xff] %v523_v51  ;;  %533 = vst [vmem:[%s1111_s28 + $0x10] sm:$0xff] %v525_v52  ;;  %v524_v60 = vmax.f32 %v516_v53, 0.0  ;;  %v519_v62 = vadd.f32 %v513_v59, %v501_v55 }
 0x10d   : > { %v526_v61 = vmax.f32 %v518_v54, 0.0  ;;  %v521_v63 = vadd.f32 %v513_v59, %v503_v56  ;;  %480 = vst [vmem:[%s1090_s19 + $0x28] sm:$0xff] %v396_v57  ;;  %v502_v0 = vmul.f32 %v495_v35, %v396_v57  ;;  %482 = vst [vmem:[%s1090_s19 + $0x38] sm:$0xff] %v473_v58  ;;  %v504_v1 = vmul.f32 %v495_v35, %v473_v58 }
 0x10e   : > { %532 = vst [vmem:[%s1111_s28 + $0x8] sm:$0xff] %v524_v60 }
 0x10f   : > { %534 = vst [vmem:[%s1111_s28 + $0x18] sm:$0xff] %v526_v61 }
 0x110   : > { %806 = shalt.err (!%p803_p9)
}
 0x111   : > { %s807_s18 = scalar_lea.hbm %s1105_s26, 1024  ;;  %s811_s17 = scalar_lea.hbm %s1207_s5, 4096 }
 0x112   : > { %p808_p0 = scmp.ne.s32.totalorder %s1105_s26, %s807_s18  ;;  %p812_p1 = scmp.lt.s32.totalorder %s1105_s26, %s1207_s5 }
 0x113   : > { %p813_p3 = scmp.lt.s32.totalorder %s811_s17, %s807_s18 }
 0x114   : > { %p809_p2 = pnand %p808_p0, %p1219_p11 }
 0x115   : > { %p814_p6 = por %p813_p3, %p812_p1 }
 0x116   : > { %p810_p13 = pneg %p809_p2 }
 0x118   : > { %p815_p10 = pnand %p814_p6, %p810_p13 }
 0x11a   : > { %818 = shalt.err (!%p815_p10)
}
 0x11b   : > { %s896_s13 = smov 512   ;;  %s897_s8 = smov 2048   ;;  %v527_v2 = vmax.f32 %v519_v62, 0.0  ;;  %v529_v3 = vmax.f32 %v521_v63, 0.0  ;;  %v520_v4 = vadd.f32 %v513_v59, %v502_v0  ;;  %v522_v5 = vadd.f32 %v513_v59, %v504_v1 }
 0x11c   : > { %s898_s16 = smov 32   ;;  %s1220_s14 = sshll.u32 %s956_s25, 9 }
 0x11d   : > { %706 = dma.vmem_to_hbm [thread:$0]  (%p1219_p11), %s1098_s20, 1024, %s1105_s26, %s540_s12, %s896_s13, %s897_s8, %s898_s16   ;;  %v528_v6 = vmax.f32 %v520_v4, 0.0  ;;  %v530_v7 = vmax.f32 %v522_v5, 0.0 }
 0x11e   : > { %535 = vst [vmem:[%s1111_s28 + $0x20] sm:$0xff] %v527_v2  ;;  %537 = vst [vmem:[%s1111_s28 + $0x30] sm:$0xff] %v529_v3  ;;  %s1157_s20 = scalar_lea.hbm %s1208_s6, %s1220_s14  ;;  %s545_s26 = scalar_lea.sflag [#allocation7], %s1033_s7 }
 0x11f   : > { %536 = vst [vmem:[%s1111_s28 + $0x28] sm:$0xff] %v528_v6  ;;  %538 = vst [vmem:[%s1111_s28 + $0x38] sm:$0xff] %v530_v7  ;;  %s819_s12 = scalar_lea.vmem %s1148_s29, 1024  ;;  %s899_s15 = smov [#allocation6]  }
 0x120   : > { %p820_p12 = scmp.ne.s32.totalorder %s1148_s29, %s819_s12  ;;  %s823_s17 = sshll.u32 %s899_s15, 4  ;;  %s824_s17 = int_to_ptr.vmem [resolvable:$false] %s823_s17 }
 0x121   : > { %s825_s11 = scalar_lea.vmem %s824_s17, 2048  ;;  %p826_p7 = scmp.lt.s32.totalorder %s1148_s29, %s824_s17 }
 0x122   : > { %p821_p4 = pnand %p820_p12, %p1219_p11  ;;  %p827_p8 = scmp.lt.s32.totalorder %s825_s11, %s819_s12 }
 0x124   : > { %p822_p5 = pneg %p821_p4  ;;  %p828_p9 = por %p827_p8, %p826_p7 }
 0x126   : > { %p829_p0 = pnand %p828_p9, %p822_p5 }
 0x128   : > { %832 = shalt.err (!%p829_p0)
}
 0x129   : > { %s833_s25 = scalar_lea.hbm %s1157_s20, 1024  ;;  %s837_s14 = scalar_lea.hbm %s1208_s6, 4096 }
 0x12a   : > { %p834_p2 = scmp.ne.s32.totalorder %s1157_s20, %s833_s25  ;;  %p838_p3 = scmp.lt.s32.totalorder %s1157_s20, %s1208_s6 }
 0x12b   : > { %p839_p6 = scmp.lt.s32.totalorder %s837_s14, %s833_s25 }
 0x12c   : > { %p835_p13 = pnand %p834_p2, %p1219_p11 }
 0x12d   : > { %p840_p10 = por %p839_p6, %p838_p3 }
 0x12e   : > { %p836_p1 = pneg %p835_p13 }
 0x130   : > { %p841_p12 = pnand %p840_p10, %p836_p1 }
 0x132   : > { %844 = shalt.err (!%p841_p12)
}
 0x133   : > { %707 = dma.vmem_to_hbm [thread:$0]  (%p1219_p11), %s1148_s29, 1024, %s1157_s20, %s545_s26, %s896_s13, %s897_s8, %s898_s16  }
 0x134 PF: > { %p722_p4 = scmp.ge.s32.totalorder %s887_s24, 2  ;;  %s589_s12 = sand.u32 1, %s875_s21  }
 0x135   : > { %p1221_p5 = scmp.ne.s32.totalorder %s1215_s10, 0  ;;  %s590_s15 = scalar_lea.sflag [#allocation4], %s589_s12 }
 0x137   : > { %p715_p7 = pnand %p722_p4, %p1221_p5 }
 0x139   : > { %p716_p8 = pneg %p715_p7 }
 0x13b   : > { %866 = dma.done.wait (%p716_p8), %s590_s15, 1024  }
 0x13c   : > { %868 = vsyncadd (%p716_p8), %s590_s15, 4294966272  ;;  %s599_s17 = scalar_lea.sflag [#allocation7], %s589_s12 }
 0x13d   : > { %870 = dma.done.wait (%p716_p8), %s599_s17, 1024  }
 0x13e   : > { %872 = vsyncadd (%p716_p8), %s599_s17, 4294966272  ;;  %p23_p11 = scmp.ge.s32.totalorder %s960_s27, 6   ;;  %s1222_s21 = smov %s879_s22 }
 0x13f   : > { %s1223_s22 = smov %s883_s23  ;;  %s1224_s23 = smov %s972_s30 }
 0x140   : > { %s1225_s24 = smov %s960_s27  ;;  %25 = sbr.rel (!%p23_p11) target bundleno = 7 (0x7), region = 102 }
 0x145   :  { %604 = vsyncpa [#allocation3], 1 }
 0x146   :  { %606 = vsyncpa [#allocation3 + $0x1], 1 }
 0x147   :  { %607 = vsyncpa [#allocation4], 1 }
 0x148   :  { %609 = vsyncpa [#allocation4 + $0x1], 1 }
 0x149   :  { %610 = vsyncpa [#allocation7], 1 }
 0x14a   :  { %612 = vsyncpa [#allocation7 + $0x1], 1 }

</bundles_post_ra>
